<compile_context>
chip_gen: v7x
topology: tpu7x:2x2x1
jax: 0.10.0
libtpu: 0.0.40
codegen_flags: <defaults>
</compile_context>

<pallas_src>
import functools
import math

import jax
import jax.numpy as jnp
from jax.experimental import pallas as pl

_P = 128  # padded feature width == TPU lane width


# --------------------------------------------------------------------------
# Fused Pallas kernel: whole forward pass, everything resident in VMEM
# --------------------------------------------------------------------------
def _fused_forward_kernel(*refs, B, L, P, n_att, n_lin):
    """refs = (x_ref, [wq,wk,wv,bq,bk,bv] * n_att, [w,b] * n_lin, o_ref).

    x_ref : (B*L, D0)  VMEM   -- raw input features (PE already folded away)
    wq/wk/wv : (D_in, P)      -- zero-padded projection weights
    bq/bk/bv : (L, P)         -- per-position additive terms (PE + bias)
    w, b     : (P, P), (1, P) -- regre-head linears (zero-padded)
    o_ref : (B*L, P)   VMEM   -- lane-dense output slab (col 0..out_dim real)
    """
    x_ref = refs[0]
    o_ref = refs[-1]
    params = refs[1:-1]

    h = x_ref[...].astype(jnp.float32)                      # (B*L, D0)

    idx = 0
    # ---- attention layers (encoder then decoder) ----
    for _ in range(n_att):
        wq, wk, wv, bq, bk, bv = params[idx:idx + 6]
        idx += 6
        q = jnp.dot(h, wq[...],
                    preferred_element_type=jnp.float32).reshape(B, L, P) + bq[...]
        k = jnp.dot(h, wk[...],
                    preferred_element_type=jnp.float32).reshape(B, L, P) + bk[...]
        v = jnp.dot(h, wv[...],
                    preferred_element_type=jnp.float32).reshape(B, L, P) + bv[...]
        # 1/sqrt(Dout) is already folded into wq / bq.
        s = jnp.einsum('bqd,bkd->bqk', q, k,
                       preferred_element_type=jnp.float32)   # (B, L, L)
        s = s - jnp.max(s, axis=-1, keepdims=True)
        p = jnp.exp(s)
        p = p * pl.reciprocal(jnp.sum(p, axis=-1, keepdims=True), approx=True)
        o = jnp.einsum('bqk,bkd->bqd', p, v,
                       preferred_element_type=jnp.float32)   # (B, L, P)
        h = o.reshape(B * L, P)

    # ---- regre head (Linear + ReLU, last layer linear) ----
    for j in range(n_lin):
        w, b = params[idx:idx + 2]
        idx += 2
        h = jnp.dot(h, w[...], preferred_element_type=jnp.float32) + b[...]
        if j < n_lin - 1:
            h = jnp.maximum(h, 0.0)

    o_ref[...] = h


def _pad2d(a, rows, cols):
    """Zero-pad a 2-D array to (rows, cols)."""
    out = jnp.zeros((rows, cols), jnp.float32)
    return out.at[:a.shape[0], :a.shape[1]].set(a.astype(jnp.float32))


# --------------------------------------------------------------------------
# Module
# --------------------------------------------------------------------------
class RegreTransfPallas:
    def __init__(self, data_expand, data_dim, encoder_list, decoder_list,
                 regre_list, key):
        self.l = data_dim
        self.data_expand = data_expand
        self.P = _P
        self.out_dim = regre_list[-1]
        self.d0 = encoder_list[0] - data_dim   # true input feature dim D

        L = self.l
        P = self.P

        # ---- raw parameter init (matches reference semantics) ----
        def init_linear(k, din, dout):
            kw, _ = jax.random.split(k)
            w = jax.random.normal(kw, (din, dout), jnp.float32) / math.sqrt(din)
            b = jnp.zeros((1, dout), jnp.float32)
            return w, b

        def init_att_block(k, dims):
            raw = []
            for i in range(len(dims) - 1):
                k, kq, kk, kv = jax.random.split(k, 4)
                raw.append((init_linear(kq, dims[i], dims[i + 1]),
                            init_linear(kk, dims[i], dims[i + 1]),
                            init_linear(kv, dims[i], dims[i + 1])))
            return raw

        k_enc, k_dec, k_reg = jax.random.split(key, 3)
        raw_att = (init_att_block(k_enc, encoder_list)
                   + init_att_block(k_dec, decoder_list))
        att_dims = ([(encoder_list[i], encoder_list[i + 1])
                     for i in range(len(encoder_list) - 1)]
                    + [(decoder_list[i], decoder_list[i + 1])
                       for i in range(len(decoder_list) - 1)])

        raw_lin = []
        for i in range(len(regre_list) - 1):
            k_reg, k_i = jax.random.split(k_reg)
            raw_lin.append(init_linear(k_i, regre_list[i], regre_list[i + 1]))

        # ---- fold PE + softmax scale, zero-pad to 128 lanes ----
        self.att_params = []
        for li, (((wq, bq), (wk, bk), (wv, bv)), (din, dout)) in enumerate(
                zip(raw_att, att_dims)):
            scale = 1.0 / math.sqrt(dout)
            if li == 0:
                # first layer sees cat([x, I]); fold the identity-PE block of
                # the weight into a per-position additive bias.
                d = din - L
                self.att_params.append((
                    _pad2d(wq[:d] * scale, d, P),
                    _pad2d(wk[:d], d, P),
                    _pad2d(wv[:d], d, P),
                    _pad2d((wq[d:d + L] + bq) * scale, L, P),
                    _pad2d(wk[d:d + L] + bk, L, P),
                    _pad2d(wv[d:d + L] + bv, L, P),
                ))
            else:
                self.att_params.append((
                    _pad2d(wq * scale, P, P),
                    _pad2d(wk, P, P),
                    _pad2d(wv, P, P),
                    _pad2d(jnp.broadcast_to(bq * scale, (L, dout)), L, P),
                    _pad2d(jnp.broadcast_to(bk, (L, dout)), L, P),
                    _pad2d(jnp.broadcast_to(bv, (L, dout)), L, P),
                ))

        self.lin_params = [(_pad2d(w, P, P), _pad2d(b, 1, P))
                           for (w, b) in raw_lin]

    def __call__(self, x):
        b, l, d = x.shape
        att_params = list(self.att_params)

        if self.data_expand:
            # TODO(synk): torch.randperm is per-call nondeterministic data
            # augmentation; we use a fixed-key permutation for reproducibility.
            idx = jax.random.permutation(jax.random.PRNGKey(42), l)
            x = x[:, idx, :]
            wq, wk, wv, bq, bk, bv = att_params[0]
            att_params[0] = (wq, wk, wv, bq[idx], bk[idx], bv[idx])

        flat = []
        for p in att_params:
            flat.extend(p)
        for p in self.lin_params:
            flat.extend(p)

        kernel = functools.partial(
            _fused_forward_kernel, B=b, L=l, P=self.P,
            n_att=len(att_params), n_lin=len(self.lin_params))

        # Single fused launch: no grid -> all operands fully resident in VMEM
        # (total parameter + activation footprint is a few hundred KB, far
        # below even v7x's 64 MiB VMEM).
        out = pl.pallas_call(
            kernel,
            out_shape=jax.ShapeDtypeStruct((b * l, self.P), jnp.float32),
        )(x.reshape(b * l, d).astype(jnp.float32), *flat)

        # Slice the lane-dense (B*L, 128) slab down to the true output width.
        return out[:, :self.out_dim].reshape(b, l, self.out_dim)


# --------------------------------------------------------------------------
# Main
# --------------------------------------------------------------------------
if __name__ == "__main__":
    key = jax.random.PRNGKey(0)
    k_x, k_params = jax.random.split(key)

    B, L, D = 2, 8, 8                 # batch, seq (== data_dim), input features
    encoder_list = [D + L, 32]        # after pe concat the feature dim is D + L
    decoder_list = [32, 32]
    regre_list = [32, 16, 1]

    model = RegreTransfPallas(
        data_expand=False,
        data_dim=L,
        encoder_list=encoder_list,
        decoder_list=decoder_list,
        regre_list=regre_list,
        key=k_params,
    )

    x = jax.random.normal(k_x, (B, L, D), jnp.float32)
    out = model(x)
    out = jax.block_until_ready(out)

    assert out.shape == (B, L, regre_list[-1]), out.shape
    assert jnp.all(jnp.isfinite(out))
    print("KERNEL_OK")
</pallas_src>

<mosaic_0001>
module attributes {stable_mosaic.version = 11 : i64} {
  func.func @_fused_forward_kernel(%arg0: memref<16x8xf32, #tpu.memory_space<vmem>>, %arg1: memref<8x128xf32, #tpu.memory_space<vmem>>, %arg2: memref<8x128xf32, #tpu.memory_space<vmem>>, %arg3: memref<8x128xf32, #tpu.memory_space<vmem>>, %arg4: memref<8x128xf32, #tpu.memory_space<vmem>>, %arg5: memref<8x128xf32, #tpu.memory_space<vmem>>, %arg6: memref<8x128xf32, #tpu.memory_space<vmem>>, %arg7: memref<128x128xf32, #tpu.memory_space<vmem>>, %arg8: memref<128x128xf32, #tpu.memory_space<vmem>>, %arg9: memref<128x128xf32, #tpu.memory_space<vmem>>, %arg10: memref<8x128xf32, #tpu.memory_space<vmem>>, %arg11: memref<8x128xf32, #tpu.memory_space<vmem>>, %arg12: memref<8x128xf32, #tpu.memory_space<vmem>>, %arg13: memref<128x128xf32, #tpu.memory_space<vmem>>, %arg14: memref<1x128xf32, #tpu.memory_space<vmem>>, %arg15: memref<128x128xf32, #tpu.memory_space<vmem>>, %arg16: memref<1x128xf32, #tpu.memory_space<vmem>>, %arg17: memref<16x128xf32, #tpu.memory_space<vmem>>) attributes {dimension_semantics = [], scalar_prefetch = 0 : i64, scratch_operands = 0 : i64, tpu.core_type = #tpu.core_type<tc>} {
    %c0 = arith.constant 0 : index
    %c0_0 = arith.constant 0 : index
    %0 = vector.load %arg0[%c0, %c0_0] : memref<16x8xf32, #tpu.memory_space<vmem>>, vector<16x8xf32>
    %c0_1 = arith.constant 0 : index
    %c0_2 = arith.constant 0 : index
    %1 = vector.load %arg1[%c0_1, %c0_2] : memref<8x128xf32, #tpu.memory_space<vmem>>, vector<8x128xf32>
    %cst = arith.constant dense<0.000000e+00> : vector<16x128xf32>
    %2 = tpu.matmul %0, %1, %cst {dimension_numbers = #tpu.dot_dimension_numbers<[1], [0], [0], [1], [0, 0, 1, 1], [], []>} : vector<16x8xf32>, vector<8x128xf32>, vector<16x128xf32> -> vector<16x128xf32>
    %3 = vector.shape_cast %2 : vector<16x128xf32> to vector<2x8x128xf32>
    %c0_3 = arith.constant 0 : index
    %c0_4 = arith.constant 0 : index
    %4 = vector.load %arg4[%c0_3, %c0_4] : memref<8x128xf32, #tpu.memory_space<vmem>>, vector<8x128xf32>
    %5 = vector.shape_cast %4 : vector<8x128xf32> to vector<1x8x128xf32>
    %6 = vector.broadcast %5 : vector<1x8x128xf32> to vector<2x8x128xf32>
    %7 = arith.addf %3, %6 : vector<2x8x128xf32>
    %c0_5 = arith.constant 0 : index
    %c0_6 = arith.constant 0 : index
    %8 = vector.load %arg2[%c0_5, %c0_6] : memref<8x128xf32, #tpu.memory_space<vmem>>, vector<8x128xf32>
    %cst_7 = arith.constant dense<0.000000e+00> : vector<16x128xf32>
    %9 = tpu.matmul %0, %8, %cst_7 {dimension_numbers = #tpu.dot_dimension_numbers<[1], [0], [0], [1], [0, 0, 1, 1], [], []>} : vector<16x8xf32>, vector<8x128xf32>, vector<16x128xf32> -> vector<16x128xf32>
    %10 = vector.shape_cast %9 : vector<16x128xf32> to vector<2x8x128xf32>
    %c0_8 = arith.constant 0 : index
    %c0_9 = arith.constant 0 : index
    %11 = vector.load %arg5[%c0_8, %c0_9] : memref<8x128xf32, #tpu.memory_space<vmem>>, vector<8x128xf32>
    %12 = vector.shape_cast %11 : vector<8x128xf32> to vector<1x8x128xf32>
    %13 = vector.broadcast %12 : vector<1x8x128xf32> to vector<2x8x128xf32>
    %14 = arith.addf %10, %13 : vector<2x8x128xf32>
    %c0_10 = arith.constant 0 : index
    %c0_11 = arith.constant 0 : index
    %15 = vector.load %arg3[%c0_10, %c0_11] : memref<8x128xf32, #tpu.memory_space<vmem>>, vector<8x128xf32>
    %cst_12 = arith.constant dense<0.000000e+00> : vector<16x128xf32>
    %16 = tpu.matmul %0, %15, %cst_12 {dimension_numbers = #tpu.dot_dimension_numbers<[1], [0], [0], [1], [0, 0, 1, 1], [], []>} : vector<16x8xf32>, vector<8x128xf32>, vector<16x128xf32> -> vector<16x128xf32>
    %17 = vector.shape_cast %16 : vector<16x128xf32> to vector<2x8x128xf32>
    %c0_13 = arith.constant 0 : index
    %c0_14 = arith.constant 0 : index
    %18 = vector.load %arg6[%c0_13, %c0_14] : memref<8x128xf32, #tpu.memory_space<vmem>>, vector<8x128xf32>
    %19 = vector.shape_cast %18 : vector<8x128xf32> to vector<1x8x128xf32>
    %20 = vector.broadcast %19 : vector<1x8x128xf32> to vector<2x8x128xf32>
    %21 = arith.addf %17, %20 : vector<2x8x128xf32>
    "tpu.trace_start"() <{level = 10 : i32, message = "bqd,bkd->bqk"}> : () -> ()
    %cst_15 = arith.constant dense<0.000000e+00> : vector<2x8x8xf32>
    %22 = tpu.matmul %7, %14, %cst_15 {dimension_numbers = #tpu.dot_dimension_numbers<[2], [2], [1], [1], [0, 0, 0, 1, 1, 1], [0], [0]>} : vector<2x8x128xf32>, vector<2x8x128xf32>, vector<2x8x8xf32> -> vector<2x8x8xf32>
    "tpu.trace_stop"() : () -> ()
    %cst_16 = arith.constant dense<0xFF800000> : vector<2x8xf32>
    %23 = vector.multi_reduction <maximumf>, %22, %cst_16 [2] : vector<2x8x8xf32> to vector<2x8xf32>
    %24 = vector.shape_cast %23 : vector<2x8xf32> to vector<2x8x1xf32>
    %25 = vector.broadcast %24 : vector<2x8x1xf32> to vector<2x8x8xf32>
    %26 = arith.subf %22, %25 : vector<2x8x8xf32>
    %27 = math.exp %26 : vector<2x8x8xf32>
    %cst_17 = arith.constant dense<0.000000e+00> : vector<2x8xf32>
    %28 = vector.multi_reduction <add>, %27, %cst_17 [2] : vector<2x8x8xf32> to vector<2x8xf32>
    %29 = vector.shape_cast %28 : vector<2x8xf32> to vector<2x8x1xf32>
    %30 = tpu.reciprocal %29 {approx = true} : vector<2x8x1xf32> -> vector<2x8x1xf32>
    %31 = vector.broadcast %30 : vector<2x8x1xf32> to vector<2x8x8xf32>
    %32 = arith.mulf %27, %31 : vector<2x8x8xf32>
    "tpu.trace_start"() <{level = 10 : i32, message = "bqk,bkd->bqd"}> : () -> ()
    %cst_18 = arith.constant dense<0.000000e+00> : vector<2x8x128xf32>
    %33 = tpu.matmul %32, %21, %cst_18 {dimension_numbers = #tpu.dot_dimension_numbers<[2], [1], [1], [2], [0, 0, 0, 1, 1, 2], [0], [0]>} : vector<2x8x8xf32>, vector<2x8x128xf32>, vector<2x8x128xf32> -> vector<2x8x128xf32>
    "tpu.trace_stop"() : () -> ()
    %34 = vector.shape_cast %33 : vector<2x8x128xf32> to vector<16x128xf32>
    %c0_19 = arith.constant 0 : index
    %c0_20 = arith.constant 0 : index
    %35 = vector.load %arg7[%c0_19, %c0_20] : memref<128x128xf32, #tpu.memory_space<vmem>>, vector<128x128xf32>
    %cst_21 = arith.constant dense<0.000000e+00> : vector<16x128xf32>
    %36 = tpu.matmul %34, %35, %cst_21 {dimension_numbers = #tpu.dot_dimension_numbers<[1], [0], [0], [1], [0, 0, 1, 1], [], []>} : vector<16x128xf32>, vector<128x128xf32>, vector<16x128xf32> -> vector<16x128xf32>
    %37 = vector.shape_cast %36 : vector<16x128xf32> to vector<2x8x128xf32>
    %c0_22 = arith.constant 0 : index
    %c0_23 = arith.constant 0 : index
    %38 = vector.load %arg10[%c0_22, %c0_23] : memref<8x128xf32, #tpu.memory_space<vmem>>, vector<8x128xf32>
    %39 = vector.shape_cast %38 : vector<8x128xf32> to vector<1x8x128xf32>
    %40 = vector.broadcast %39 : vector<1x8x128xf32> to vector<2x8x128xf32>
    %41 = arith.addf %37, %40 : vector<2x8x128xf32>
    %c0_24 = arith.constant 0 : index
    %c0_25 = arith.constant 0 : index
    %42 = vector.load %arg8[%c0_24, %c0_25] : memref<128x128xf32, #tpu.memory_space<vmem>>, vector<128x128xf32>
    %cst_26 = arith.constant dense<0.000000e+00> : vector<16x128xf32>
    %43 = tpu.matmul %34, %42, %cst_26 {dimension_numbers = #tpu.dot_dimension_numbers<[1], [0], [0], [1], [0, 0, 1, 1], [], []>} : vector<16x128xf32>, vector<128x128xf32>, vector<16x128xf32> -> vector<16x128xf32>
    %44 = vector.shape_cast %43 : vector<16x128xf32> to vector<2x8x128xf32>
    %c0_27 = arith.constant 0 : index
    %c0_28 = arith.constant 0 : index
    %45 = vector.load %arg11[%c0_27, %c0_28] : memref<8x128xf32, #tpu.memory_space<vmem>>, vector<8x128xf32>
    %46 = vector.shape_cast %45 : vector<8x128xf32> to vector<1x8x128xf32>
    %47 = vector.broadcast %46 : vector<1x8x128xf32> to vector<2x8x128xf32>
    %48 = arith.addf %44, %47 : vector<2x8x128xf32>
    %c0_29 = arith.constant 0 : index
    %c0_30 = arith.constant 0 : index
    %49 = vector.load %arg9[%c0_29, %c0_30] : memref<128x128xf32, #tpu.memory_space<vmem>>, vector<128x128xf32>
    %cst_31 = arith.constant dense<0.000000e+00> : vector<16x128xf32>
    %50 = tpu.matmul %34, %49, %cst_31 {dimension_numbers = #tpu.dot_dimension_numbers<[1], [0], [0], [1], [0, 0, 1, 1], [], []>} : vector<16x128xf32>, vector<128x128xf32>, vector<16x128xf32> -> vector<16x128xf32>
    %51 = vector.shape_cast %50 : vector<16x128xf32> to vector<2x8x128xf32>
    %c0_32 = arith.constant 0 : index
    %c0_33 = arith.constant 0 : index
    %52 = vector.load %arg12[%c0_32, %c0_33] : memref<8x128xf32, #tpu.memory_space<vmem>>, vector<8x128xf32>
    %53 = vector.shape_cast %52 : vector<8x128xf32> to vector<1x8x128xf32>
    %54 = vector.broadcast %53 : vector<1x8x128xf32> to vector<2x8x128xf32>
    %55 = arith.addf %51, %54 : vector<2x8x128xf32>
    "tpu.trace_start"() <{level = 10 : i32, message = "bqd,bkd->bqk"}> : () -> ()
    %cst_34 = arith.constant dense<0.000000e+00> : vector<2x8x8xf32>
    %56 = tpu.matmul %41, %48, %cst_34 {dimension_numbers = #tpu.dot_dimension_numbers<[2], [2], [1], [1], [0, 0, 0, 1, 1, 1], [0], [0]>} : vector<2x8x128xf32>, vector<2x8x128xf32>, vector<2x8x8xf32> -> vector<2x8x8xf32>
    "tpu.trace_stop"() : () -> ()
    %cst_35 = arith.constant dense<0xFF800000> : vector<2x8xf32>
    %57 = vector.multi_reduction <maximumf>, %56, %cst_35 [2] : vector<2x8x8xf32> to vector<2x8xf32>
    %58 = vector.shape_cast %57 : vector<2x8xf32> to vector<2x8x1xf32>
    %59 = vector.broadcast %58 : vector<2x8x1xf32> to vector<2x8x8xf32>
    %60 = arith.subf %56, %59 : vector<2x8x8xf32>
    %61 = math.exp %60 : vector<2x8x8xf32>
    %cst_36 = arith.constant dense<0.000000e+00> : vector<2x8xf32>
    %62 = vector.multi_reduction <add>, %61, %cst_36 [2] : vector<2x8x8xf32> to vector<2x8xf32>
    %63 = vector.shape_cast %62 : vector<2x8xf32> to vector<2x8x1xf32>
    %64 = tpu.reciprocal %63 {approx = true} : vector<2x8x1xf32> -> vector<2x8x1xf32>
    %65 = vector.broadcast %64 : vector<2x8x1xf32> to vector<2x8x8xf32>
    %66 = arith.mulf %61, %65 : vector<2x8x8xf32>
    "tpu.trace_start"() <{level = 10 : i32, message = "bqk,bkd->bqd"}> : () -> ()
    %cst_37 = arith.constant dense<0.000000e+00> : vector<2x8x128xf32>
    %67 = tpu.matmul %66, %55, %cst_37 {dimension_numbers = #tpu.dot_dimension_numbers<[2], [1], [1], [2], [0, 0, 0, 1, 1, 2], [0], [0]>} : vector<2x8x8xf32>, vector<2x8x128xf32>, vector<2x8x128xf32> -> vector<2x8x128xf32>
    "tpu.trace_stop"() : () -> ()
    %68 = vector.shape_cast %67 : vector<2x8x128xf32> to vector<16x128xf32>
    %c0_38 = arith.constant 0 : index
    %c0_39 = arith.constant 0 : index
    %69 = vector.load %arg13[%c0_38, %c0_39] : memref<128x128xf32, #tpu.memory_space<vmem>>, vector<128x128xf32>
    %cst_40 = arith.constant dense<0.000000e+00> : vector<16x128xf32>
    %70 = tpu.matmul %68, %69, %cst_40 {dimension_numbers = #tpu.dot_dimension_numbers<[1], [0], [0], [1], [0, 0, 1, 1], [], []>} : vector<16x128xf32>, vector<128x128xf32>, vector<16x128xf32> -> vector<16x128xf32>
    %c0_41 = arith.constant 0 : index
    %c0_42 = arith.constant 0 : index
    %71 = vector.load %arg14[%c0_41, %c0_42] : memref<1x128xf32, #tpu.memory_space<vmem>>, vector<1x128xf32>
    %72 = vector.broadcast %71 : vector<1x128xf32> to vector<16x128xf32>
    %73 = arith.addf %70, %72 : vector<16x128xf32>
    %cst_43 = arith.constant 0.000000e+00 : f32
    %74 = vector.broadcast %cst_43 : f32 to vector<16x128xf32>
    %75 = arith.maximumf %73, %74 : vector<16x128xf32>
    %c0_44 = arith.constant 0 : index
    %c0_45 = arith.constant 0 : index
    %76 = vector.load %arg15[%c0_44, %c0_45] : memref<128x128xf32, #tpu.memory_space<vmem>>, vector<128x128xf32>
    %cst_46 = arith.constant dense<0.000000e+00> : vector<16x128xf32>
    %77 = tpu.matmul %75, %76, %cst_46 {dimension_numbers = #tpu.dot_dimension_numbers<[1], [0], [0], [1], [0, 0, 1, 1], [], []>} : vector<16x128xf32>, vector<128x128xf32>, vector<16x128xf32> -> vector<16x128xf32>
    %c0_47 = arith.constant 0 : index
    %c0_48 = arith.constant 0 : index
    %78 = vector.load %arg16[%c0_47, %c0_48] : memref<1x128xf32, #tpu.memory_space<vmem>>, vector<1x128xf32>
    %79 = vector.broadcast %78 : vector<1x128xf32> to vector<16x128xf32>
    %80 = arith.addf %77, %79 : vector<16x128xf32>
    %c0_49 = arith.constant 0 : index
    %c0_50 = arith.constant 0 : index
    %81 = vector.load %arg17[%c0_49, %c0_50] : memref<16x128xf32, #tpu.memory_space<vmem>>, vector<16x128xf32>
    tpu.vector_store %arg17[%c0_49, %c0_50], %80 {strides = array<i32>} : memref<16x128xf32, #tpu.memory_space<vmem>>, vector<16x128xf32>,
    return
  }
}

</mosaic_0001>

<bundles_post_ra>
// kernel: tpu_custom_call.1
= control target key start
LH: loop header
LB: loop body
LE: loop exit
PB: predicated region body
PF: predicated region fallthrough
CT: control target
= control target key end

     0   :  { %s2490_s0 = inlined_call_operand.vmem [shape: f32[16,8], index: 0, kind: input, shape index: {}]   ;;  %s2491_s1 = inlined_call_operand.vmem [shape: f32[8,128], index: 1, kind: input, shape index: {}]   ;;  %s2492_s2 = inlined_call_operand.vmem [shape: f32[8,128], index: 2, kind: input, shape index: {}]   ;;  %s2493_s3 = inlined_call_operand.vmem [shape: f32[8,128], index: 3, kind: input, shape index: {}]   ;;  %s2494_s4 = inlined_call_operand.vmem [shape: f32[8,128], index: 4, kind: input, shape index: {}]   ;;  %s2495_s5 = inlined_call_operand.vmem [shape: f32[8,128], index: 5, kind: input, shape index: {}]   ;;  %s2496_s6 = inlined_call_operand.hbm [shape: f32[8,128], index: 6, kind: input, shape index: {}]   ;;  %s2497_s7 = inlined_call_operand.hbm [shape: f32[128,128], index: 7, kind: input, shape index: {}]   ;;  %s2498_s8 = inlined_call_operand.hbm [shape: f32[128,128], index: 8, kind: input, shape index: {}]   ;;  %s2499_s9 = inlined_call_operand.hbm [shape: f32[128,128], index: 9, kind: input, shape index: {}]   ;;  %s2500_s10 = inlined_call_operand.vmem [shape: f32[8,128], index: 10, kind: input, shape index: {}]   ;;  %s2501_s11 = inlined_call_operand.vmem [shape: f32[8,128], index: 11, kind: input, shape index: {}]   ;;  %s2502_s12 = inlined_call_operand.vmem [shape: f32[8,128], index: 12, kind: input, shape index: {}]   ;;  %s2503_s13 = inlined_call_operand.hbm [shape: f32[128,128], index: 13, kind: input, shape index: {}]   ;;  %s2504_s14 = inlined_call_operand.vmem [shape: f32[1,128], index: 14, kind: input, shape index: {}]   ;;  %s2505_s15 = inlined_call_operand.hbm [shape: f32[128,128], index: 15, kind: input, shape index: {}]   ;;  %s2506_s16 = inlined_call_operand.vmem [shape: f32[1,128], index: 16, kind: input, shape index: {}]   ;;  %s2507_s17 = inlined_call_operand.hbm [shape: f32[16,128], index: 17, kind: output, shape index: {}]  }
   0x1   :  { %2510 = sst [smem:[#allocation19_spill]] %s2490_s0 }
   0x2   :  { %2511 = sst [smem:[#allocation20_spill]] %s2491_s1 }
   0x3   :  { %2512 = sst [smem:[#allocation21_spill]] %s2507_s17 }
   0x4   :  { %22 = vsyncpa [#allocation3], 0 }
   0x5   :  { %23 = vsyncpa [#allocation6], 0 }
   0x6   :  { %24 = vsyncpa [#allocation9], 0 }
   0x7   :  { %25 = vsyncpa [#allocation12], 0 }
   0x8   :  { %26 = vsyncpa [#allocation4], 0  ;;  %s2209_s24 = smov [#allocation5]   ;;  %s2045_s28 = scalar_lea.hbm %s2497_s7, 2048 }
   0x9   :  { %s54_s25 = sshll.u32 %s2209_s24, 4  ;;  %p2046_p0 = scmp.ne.s32.totalorder %s2497_s7, %s2045_s28  ;;  %s55_s25 = int_to_ptr.vmem [resolvable:$true] %s54_s25 }
   0xa   :  { %p2049_p1 = scmp.lt.u32.totalorder %s2045_s28, %s2497_s7 }
   0xc   :  { %p2051_p2 = pnand %p2049_p1, %p2046_p0 }
   0xe   :  { %2054 = shalt.err (!%p2051_p2)
}
   0xf   :  { %s2055_s19 = scalar_lea.vmem %s55_s25, 2048  ;;  %p2060_p4 = scmp.lt.s32.totalorder %s55_s25, %s55_s25 }
  0x10   :  { %p2056_p3 = scmp.ne.s32.totalorder %s55_s25, %s2055_s19  ;;  %p2061_p5 = scmp.lt.s32.totalorder %s2055_s19, %s2055_s19 }
  0x12   :  { %p2062_p6 = por %p2061_p5, %p2060_p4 }
  0x14   :  { %p2063_p7 = pnand %p2062_p6, %p2056_p3 }
  0x16   :  { %2066 = shalt.err (!%p2063_p7)
}
  0x17   :  { %s2210_s1 = smov 128   ;;  %s2211_s20 = smov 8  }
  0x18   :  { %60 = dma.hbm_to_vmem [thread:$0]  %s2497_s7, 2048, %s55_s25, [#allocation6], %s2210_s1, %s2210_s1, %s2211_s20  }
  0x19   :  { %s2212_s23 = smov [#allocation8]   ;;  %s2213_s26 = smov [#allocation2]  }
  0x1a   :  { %s78_s24 = sshll.u32 %s2212_s23, 4  ;;  %s45_s27 = sshll.u32 %s2213_s26, 4  ;;  %s79_s24 = int_to_ptr.vmem [resolvable:$true] %s78_s24  ;;  %s46_s27 = int_to_ptr.vmem [resolvable:$true] %s45_s27 }
  0x1b   :  { %s2067_s0 = scalar_lea.hbm %s2499_s9, 2048 }
  0x1c   :  { %p2068_p8 = scmp.ne.s32.totalorder %s2499_s9, %s2067_s0  ;;  %p2071_p9 = scmp.lt.u32.totalorder %s2067_s0, %s2499_s9 }
  0x1e   :  { %p2073_p10 = pnand %p2071_p9, %p2068_p8 }
  0x20   :  { %2076 = shalt.err (!%p2073_p10)
}
  0x21   :  { %s2077_s7 = scalar_lea.vmem %s79_s24, 2048  ;;  %p2082_p12 = scmp.lt.s32.totalorder %s79_s24, %s79_s24 }
  0x22   :  { %p2078_p11 = scmp.ne.s32.totalorder %s79_s24, %s2077_s7  ;;  %p2083_p13 = scmp.lt.s32.totalorder %s2077_s7, %s2077_s7 }
  0x24   :  { %p2084_p0 = por %p2083_p13, %p2082_p12 }
  0x26   :  { %p2085_p1 = pnand %p2084_p0, %p2078_p11 }
  0x28   :  { %2088 = shalt.err (!%p2085_p1)
}
  0x29   :  { %84 = dma.hbm_to_vmem [thread:$0]  %s2499_s9, 2048, %s79_s24, [#allocation9], %s2210_s1, %s2210_s1, %s2211_s20  }
  0x2a   :  { %s2089_s23 = scalar_lea.hbm %s2496_s6, 128 }
  0x2b   :  { %p2090_p2 = scmp.ne.s32.totalorder %s2496_s6, %s2089_s23  ;;  %p2093_p3 = scmp.lt.u32.totalorder %s2089_s23, %s2496_s6 }
  0x2d   :  { %p2095_p4 = pnand %p2093_p3, %p2090_p2 }
  0x2f   :  { %2098 = shalt.err (!%p2095_p4)
}
  0x30   :  { %s2099_s30 = scalar_lea.vmem %s46_s27, 128  ;;  %p2104_p6 = scmp.lt.s32.totalorder %s46_s27, %s46_s27 }
  0x31   :  { %p2100_p5 = scmp.ne.s32.totalorder %s46_s27, %s2099_s30  ;;  %p2105_p7 = scmp.lt.s32.totalorder %s2099_s30, %s2099_s30 }
  0x33   :  { %p2106_p8 = por %p2105_p7, %p2104_p6 }
  0x35   :  { %p2107_p9 = pnand %p2106_p8, %p2100_p5 }
  0x37   :  { %2110 = shalt.err (!%p2107_p9)
}
  0x38   :  { %48 = dma.hbm_to_vmem [thread:$0]  %s2496_s6, 128, %s46_s27, [#allocation3]  }
  0x39   :  { %s2214_s18 = smov [#allocation7]   ;;  %s2215_s7 = smov [#allocation10]  }
  0x3a   :  { %s66_s19 = sshll.u32 %s2214_s18, 4  ;;  %s96_s25 = sshll.u32 %s2215_s7, 4  ;;  %s67_s19 = int_to_ptr.vmem [resolvable:$true] %s66_s19  ;;  %s97_s25 = int_to_ptr.vmem [resolvable:$true] %s96_s25 }
  0x3b   :  { %s2111_s17 = scalar_lea.hbm %s2498_s8, 2048 }
  0x3c   :  { %p2112_p10 = scmp.ne.s32.totalorder %s2498_s8, %s2111_s17  ;;  %p2115_p11 = scmp.lt.u32.totalorder %s2111_s17, %s2498_s8 }
  0x3e   :  { %p2117_p12 = pnand %p2115_p11, %p2112_p10 }
  0x40   :  { %2120 = shalt.err (!%p2117_p12)
}
  0x41   :  { %s2121_s6 = scalar_lea.vmem %s67_s19, 2048  ;;  %p2126_p0 = scmp.lt.s32.totalorder %s67_s19, %s67_s19 }
  0x42   :  { %p2122_p13 = scmp.ne.s32.totalorder %s67_s19, %s2121_s6  ;;  %p2127_p1 = scmp.lt.s32.totalorder %s2121_s6, %s2121_s6 }
  0x44   :  { %p2128_p2 = por %p2127_p1, %p2126_p0 }
  0x46   :  { %p2129_p3 = pnand %p2128_p2, %p2122_p13 }
  0x48   :  { %2132 = shalt.err (!%p2129_p3)
}
  0x49   :  { %72 = dma.hbm_to_vmem [thread:$0]  %s2498_s8, 2048, %s67_s19, [#allocation6], %s2210_s1, %s2210_s1, %s2211_s20  }
  0x4a   :  { %s2133_s24 = scalar_lea.hbm %s2503_s13, 2048 }
  0x4b   :  { %p2134_p4 = scmp.ne.s32.totalorder %s2503_s13, %s2133_s24  ;;  %p2137_p5 = scmp.lt.u32.totalorder %s2133_s24, %s2503_s13 }
  0x4d   :  { %p2139_p6 = pnand %p2137_p5, %p2134_p4 }
  0x4f   :  { %2142 = shalt.err (!%p2139_p6)
}
  0x50   :  { %s2143_s17 = scalar_lea.vmem %s97_s25, 2048  ;;  %p2148_p8 = scmp.lt.s32.totalorder %s97_s25, %s97_s25 }
  0x51   :  { %p2144_p7 = scmp.ne.s32.totalorder %s97_s25, %s2143_s17  ;;  %p2149_p9 = scmp.lt.s32.totalorder %s2143_s17, %s2143_s17 }
  0x53   :  { %p2150_p10 = por %p2149_p9, %p2148_p8 }
  0x55   :  { %p2151_p11 = pnand %p2150_p10, %p2144_p7 }
  0x57   :  { %2154 = shalt.err (!%p2151_p11)
}
  0x58   :  { %102 = dma.hbm_to_vmem [thread:$0]  %s2503_s13, 2048, %s97_s25, [#allocation9], %s2210_s1, %s2210_s1, %s2211_s20  }
  0x59   :  { %s2216_s23 = smov [#allocation11]   ;;  %s2155_s6 = scalar_lea.hbm %s2505_s15, 2048 }
  0x5a   :  { %s110_s26 = sshll.u32 %s2216_s23, 4  ;;  %p2156_p12 = scmp.ne.s32.totalorder %s2505_s15, %s2155_s6  ;;  %s111_s26 = int_to_ptr.vmem [resolvable:$true] %s110_s26 }
  0x5b   :  { %p2159_p13 = scmp.lt.u32.totalorder %s2155_s6, %s2505_s15 }
  0x5d   :  { %p2161_p0 = pnand %p2159_p13, %p2156_p12 }
  0x5f   :  { %2164 = shalt.err (!%p2161_p0)
}
  0x60   :  { %s2165_s24 = scalar_lea.vmem %s111_s26, 2048  ;;  %p2170_p2 = scmp.lt.s32.totalorder %s111_s26, %s111_s26 }
  0x61   :  { %p2166_p1 = scmp.ne.s32.totalorder %s111_s26, %s2165_s24  ;;  %p2171_p3 = scmp.lt.s32.totalorder %s2165_s24, %s2165_s24 }
  0x63   :  { %p2172_p4 = por %p2171_p3, %p2170_p2 }
  0x65   :  { %p2173_p5 = pnand %p2172_p4, %p2166_p1 }
  0x67   :  { %2176 = shalt.err (!%p2173_p5)
}
  0x68   :  { %116 = dma.hbm_to_vmem [thread:$0]  %s2505_s15, 2048, %s111_s26, [#allocation12], %s2210_s1, %s2210_s1, %s2211_s20  }
  0x69   :  { %2199 = dma.done.wait [#allocation3], 128  }
  0x6a   :  { %2200 = vsyncadd [#allocation3], 4294967168 }
  0x6b   :  { %2201 = dma.done.wait [#allocation6], 4096  }
  0x6c   :  { %2202 = vsyncadd [#allocation6], 4294963200 }
  0x6d   :  { %2203 = dma.done.wait [#allocation9], 4096  }
  0x6e   :  { %2204 = vsyncadd [#allocation9], 4294963200 }
  0x6f   :  { %2205 = dma.done.wait [#allocation12], 2048  }
  0x70   :  { %2206 = vsyncadd [#allocation12], 4294965248  ;;  %vm140_vm0 = vcmask 64512   ;;  %v225_v0 = vld [vmem:[%s2492_s2] sm:$0xff]  ;;  %s2513_s17 = sld [smem:[#allocation19_spill]]  ;;  %s2514_s15 = sld [smem:[#allocation20_spill]] }
  0x71   :  { %1633 = vmatprep.subr.mxu1 %v225_v0  ;;  %v304_v4 = vld [vmem:[%s2493_s3] sm:$0xff]  ;;  %v2217_v5 = vmov 0.0   ;;  %vm2218_vm1 = vmmov 0   ;;  %v380_v14 = vld [vmem:[#allocation2] sm:$0xff]  ;;  %v691_v37 = vld [vmem:[#allocation5] sm:$0xff]  ;;  %s2219_s25 = smov [#allocation13]  }
  0x72   :  { %1634 = vmatpush3.msra.mxu1 %v225_v0  ;;  %v301_v6 = vld [vmem:[%s2495_s5] sm:$0xff]  ;;  %v692_v38 = vld [vmem:[#allocation5 + $0x8] sm:$0xff]  ;;  %v785_v39 = vld [vmem:[#allocation7] sm:$0xff]  ;;  %s1486_s18 = sshll.u32 %s2219_s25, 4  ;;  %s1487_s18 = int_to_ptr.vmem [resolvable:$true] %s1486_s18 }
  0x73   :  { %1653 = vmatprep.subr.mxu1 %v2217_v5  ;;  %v222_v9 = vld [vmem:[%s2494_s4] sm:$0xff]  ;;  %v1858_v40 = vpack.c.bf16 %v692_v38, %v691_v37  ;;  %v786_v41 = vld [vmem:[#allocation7 + $0x8] sm:$0xff]  ;;  %v694_v46 = vld [vmem:[#allocation5 + $0x18] sm:$0xff]  ;;  %p2182_p7 = scmp.lt.s32.totalorder %s1487_s18, %s1487_s18 }
  0x74   :  { %v1890_v42 = vpack.c.bf16 %v786_v41, %v785_v39  ;;  %v693_v45 = vld [vmem:[#allocation5 + $0x10] sm:$0xff]  ;;  %v788_v51 = vld [vmem:[#allocation7 + $0x18] sm:$0xff]  ;;  %v695_v52 = vld [vmem:[#allocation5 + $0x20] sm:$0xff] }
  0x75   :  { %v1862_v49 = vpack.c.bf16 %v694_v46, %v693_v45  ;;  %v787_v50 = vld [vmem:[#allocation7 + $0x10] sm:$0xff]  ;;  %v696_v53 = vld [vmem:[#allocation5 + $0x28] sm:$0xff]  ;;  %v789_v58 = vld [vmem:[#allocation7 + $0x20] sm:$0xff] }
  0x76   :  { %v137_v1 = vld [vmem:[%s2513_s17] sm:$0xff]  ;;  %v138_v3 = vld [vmem:[%s2513_s17 + $0x8] sm:$0xff]  ;;  %v1894_v56 = vpack.c.bf16 %v788_v51, %v787_v50  ;;  %v1866_v57 = vpack.c.bf16 %v696_v53, %v695_v52  ;;  %v790_v59 = vld [vmem:[#allocation7 + $0x28] sm:$0xff] }
  0x77   :  { %v139_v2 = vld [vmem:[%s2514_s15] sm:$0xff]  ;;  %1635 = vmatprep.mubr.msk.f32.mxu1 %vm140_vm0, %v137_v1  ;;  %1630 = vmatprep.mubr.msk.f32.mxu0 %vm140_vm0, %v137_v1  ;;  %v698_v61 = vld [vmem:[#allocation5 + $0x38] sm:$0xff]  ;;  %v1898_v62 = vpack.c.bf16 %v790_v59, %v789_v58  ;;  %v883_v37 = vld [vmem:[#allocation8 + $0x20] sm:$0xff] }
  0x78   :  { %1628 = vmatprep.subr.mxu0 %v139_v2  ;;  %1636 = vmatmul.mubr.msk.f32.vlgmr.msra.gmra.mrb[0].mxu1 %vm140_vm0, %v138_v3  ;;  %v697_v60 = vld [vmem:[#allocation5 + $0x30] sm:$0xff]  ;;  %v884_v38 = vld [vmem:[#allocation8 + $0x28] sm:$0xff]  ;;  %v891_v50 = vld [vmem:[#allocation8 + $0x60] sm:$0xff] }
  0x79   :  { %1629 = vmatpush3.msra.mxu0 %v139_v2  ;;  %1655 = vmatprep.mubr.msk.f32.mxu1 %vm2218_vm1, %v2217_v5  ;;  %v1870_v63 = vpack.c.bf16 %v698_v61, %v697_v60  ;;  %v791_v0 = vld [vmem:[#allocation7 + $0x30] sm:$0xff]  ;;  %v699_v2 = vld [vmem:[#allocation5 + $0x40] sm:$0xff]  ;;  %v888_v45 = vld [vmem:[#allocation8 + $0x48] sm:$0xff] }
  0x7a   :  { %1638 = vmatprep.subr.mxu0 %v304_v4  ;;  %1631 = vmatmul.mubr.msk.f32.vlgmr.msra.gmra.mrb[0].mxu0 %vm140_vm0, %v138_v3  ;;  %v885_v41 = vld [vmem:[#allocation8 + $0x30] sm:$0xff]  ;;  %v892_v51 = vld [vmem:[#allocation8 + $0x68] sm:$0xff] }
  0x7b   :  { %1639 = vmatpush3.msra.mxu0 %v304_v4  ;;  %1640 = vmatprep.mubr.msk.f32.mxu0 %vm140_vm0, %v137_v1  ;;  %v792_v1 = vld [vmem:[#allocation7 + $0x38] sm:$0xff]  ;;  %v1946_v52 = vpack.c.bf16 %v892_v51, %v891_v50  ;;  %v893_v53 = vld [vmem:[#allocation8 + $0x70] sm:$0xff] }
  0x7c   :  { %1643 = vmatprep.subr.mxu0 %v2217_v5  ;;  %v1902_v4 = vpack.c.bf16 %v792_v1, %v791_v0  ;;  %v782_v61 = vld [vmem:[%s2500_s10] sm:$0xff]  ;;  %v1296_v51 = vld [vmem:[#allocation10 + $0x78] sm:$0xff] }
  0x7d   :  { %v1295_v50 = vld [vmem:[#allocation10 + $0x70] sm:$0xff] }
  0x7e   :  { %1641 = vmatmul.mubr.msk.f32.vlgmr.msra.gmra.mrb[2].mxu0 %vm140_vm0, %v138_v3  ;;  %v700_v3 = vld [vmem:[#allocation5 + $0x48] sm:$0xff] }
  0x7f   :  { %1645 = vmatprep.mubr.msk.f32.mxu0 %vm2218_vm1, %v2217_v5 }
 0x14b   :  { %v1637_v7 = vpop.f32.mrb[0].mxu1 }
 0x14c   :  { %v292_v8 = vpop.f32.mrb[1].mxu1  ;;  %v303_v15 = vadd.f32 %v1637_v7, %v301_v6  ;;  %v793_v7 = vld [vmem:[#allocation7 + $0x40] sm:$0xff] }
 0x14d   :  { %v302_v10 = vadd.f32 %v301_v6, %v292_v8  ;;  %v1632_v11 = vpop.f32.mrb[0].mxu0  ;;  %v1874_v6 = vpack.c.bf16 %v700_v3, %v699_v2  ;;  %v794_v8 = vld [vmem:[#allocation7 + $0x48] sm:$0xff]  ;;  %v970_v2 = vld [vmem:[%s2502_s12] sm:$0xff] }
 0x14e   :  { %v213_v12 = vpop.f32.mrb[1].mxu0  ;;  %v224_v20 = vadd.f32 %v1632_v11, %v222_v9  ;;  %v1906_v11 = vpack.c.bf16 %v794_v8, %v793_v7 }
 0x14f   :  { %v223_v13 = vadd.f32 %v222_v9, %v213_v12  ;;  %1644 = vmatpush3.xpose.msra.mxu0 %v302_v10  ;;  %v701_v9 = vld [vmem:[#allocation5 + $0x50] sm:$0xff]  ;;  %v702_v10 = vld [vmem:[#allocation5 + $0x58] sm:$0xff] }
 0x150   :  { %1648 = vmatprep.subr.mxu0 %v2217_v5  ;;  %v1878_v12 = vpack.c.bf16 %v702_v10, %v701_v9 }
 0x151   :  { %v1642_v16 = vpop.f32.mrb[2].mxu0 }
 0x152   :  { %1646 = vmatmul.mubr.f32.vlgmr.msra.gmra.mrb[4].mxu0 %v223_v13  ;;  %v371_v17 = vpop.f32.mrb[3].mxu0  ;;  %v382_v18 = vadd.f32 %v1642_v16, %v380_v14  ;;  %v795_v13 = vld [vmem:[#allocation7 + $0x50] sm:$0xff]  ;;  %v704_v16 = vld [vmem:[#allocation5 + $0x68] sm:$0xff] }
 0x153   :  { %1649 = vmatpush3.xpose.msra.mxu0 %v303_v15  ;;  %1650 = vmatprep.mubr.msk.f32.mxu0 %vm2218_vm1, %v2217_v5  ;;  %v381_v19 = vadd.f32 %v380_v14, %v371_v17  ;;  %v796_v14 = vld [vmem:[#allocation7 + $0x58] sm:$0xff]  ;;  %v703_v15 = vld [vmem:[#allocation5 + $0x60] sm:$0xff] }
 0x154   :  { %1658 = vmatprep.subr.mxu0 %v2217_v5  ;;  %v1910_v17 = vpack.c.bf16 %v796_v14, %v795_v13 }
 0x155   :  { %1654 = vmatpush3.msra.mxu1 %v381_v19  ;;  %v797_v19 = vld [vmem:[#allocation7 + $0x60] sm:$0xff] }
 0x156   :  { %1651 = vmatmul.mubr.f32.vlgmr.msra.gmra.mrb[6].mxu0 %v224_v20  ;;  %1859 = vmatprep.subr.bf16.mxu1 %v1858_v40  ;;  %v798_v20 = vld [vmem:[#allocation7 + $0x68] sm:$0xff] }
 0x157   :  { %1659 = vmatpush3.msra.mxu0 %v382_v18  ;;  %1660 = vmatprep.mubr.msk.f32.mxu0 %vm2218_vm1, %v2217_v5  ;;  %v1882_v18 = vpack.c.bf16 %v704_v16, %v703_v15 }
 0x158   :  { %1891 = vmatprep.subr.bf16.mxu0 %v1890_v42 }
 0x225   :  { %v449_v21 = vpop.f32.mrb[4].mxu0 }
 0x226   :  { %v1647_v22 = vpop.f32.mrb[5].mxu0  ;;  %v523_v23 = vsel %vm140_vm0, %v449_v21, -inf }
 0x227   :  { %524 = vmax.xlane.f32.xlu0 %v523_v23  ;;  %v705_v22 = vld [vmem:[#allocation5 + $0x70] sm:$0xff]  ;;  %v706_v23 = vld [vmem:[#allocation5 + $0x78] sm:$0xff] }
 0x229   :  { %v519_v24 = vpop.f32.mrb[6].mxu0 }
 0x22a   :  { %v1652_v25 = vpop.f32.mrb[7].mxu0  ;;  %v526_v26 = vsel %vm140_vm0, %v519_v24, -inf }
 0x22b   :  { %527 = vmax.xlane.f32.xlu0 %v526_v26  ;;  %v799_v25 = vld [vmem:[#allocation7 + $0x70] sm:$0xff]  ;;  %v800_v26 = vld [vmem:[#allocation7 + $0x78] sm:$0xff] }
 0x2b4   :  { %v525_v27 = vpop.xlane.xlu0 %524 }
 0x2b5   :  { %v529_v28 = vsub.f32 %v449_v21, %v525_v27  ;;  %v1914_v21 = vpack.c.bf16 %v798_v20, %v797_v19  ;;  %v1918_v27 = vpack.c.bf16 %v800_v26, %v799_v25  ;;  %v1281_v26 = vld [vmem:[#allocation10] sm:$0xff] }
 0x2b7   :  { %v531_v29 = vmul.f32 1.442695, %v529_v28  ;;  %v879_v28 = vld [vmem:[#allocation8] sm:$0xff] }
 0x2b8   :  { %v528_v30 = vpop.xlane.xlu0 %527 }
 0x2b9   :  { %2029 = vpow2.f32 %v531_v29  ;;  %v530_v31 = vsub.f32 %v519_v24, %v528_v30  ;;  %v1886_v24 = vpack.c.bf16 %v706_v23, %v705_v22  ;;  %v880_v29 = vld [vmem:[#allocation8 + $0x8] sm:$0xff] }
 0x2ba   :  { %v1922_v30 = vpack.c.bf16 %v880_v29, %v879_v28 }
 0x2bb   :  { %v533_v32 = vmul.f32 1.442695, %v530_v31 }
 0x2bd   :  { %2031 = vpow2.f32 %v533_v32  ;;  %v881_v32 = vld [vmem:[#allocation8 + $0x10] sm:$0xff] }
 0x2c3   :  { %v2030_v33 = vpop.eup %2029 }
 0x2c4   :  { %v535_v34 = vsel %vm140_vm0, %v2030_v33, 0.0 }
 0x2c5   :  { %536 = vadd.xlane.f32.xlu1 %v535_v34 }
 0x2c7   :  { %v2032_v35 = vpop.eup %2031 }
 0x2c8   :  { %v538_v36 = vsel %vm140_vm0, %v2032_v35, 0.0 }
 0x2c9   :  { %539 = vadd.xlane.f32.xlu1 %v538_v36 }
 0x352   :  { %v537_v43 = vpop.xlane.xlu1 %536 }
 0x353   :  { %2033 = vrcp.f32 %v537_v43 }
 0x356   :  { %v540_v44 = vpop.xlane.xlu1 %539 }
 0x357   :  { %2035 = vrcp.f32 %v540_v44  ;;  %v887_v44 = vld [vmem:[#allocation8 + $0x40] sm:$0xff] }
 0x358   :  { %v1938_v46 = vpack.c.bf16 %v888_v45, %v887_v44  ;;  %v1291_v44 = vld [vmem:[#allocation10 + $0x50] sm:$0xff]  ;;  %v1292_v45 = vld [vmem:[#allocation10 + $0x58] sm:$0xff] }
 0x35d   :  { %v2034_v47 = vpop.eup %2033 }
 0x35e   :  { %v543_v48 = vmul.f32 %v2034_v47, %v2030_v33  ;;  %v882_v33 = vld [vmem:[#allocation8 + $0x18] sm:$0xff]  ;;  %v889_v47 = vld [vmem:[#allocation8 + $0x50] sm:$0xff] }
 0x360   :  { %1656 = vmatmul.mubr.msk.f32.vlgmr.msra.gmra.mrb[2].mxu1 %vm140_vm0, %v543_v48  ;;  %v890_v48 = vld [vmem:[#allocation8 + $0x58] sm:$0xff] }
 0x361   :  { %v2036_v54 = vpop.eup %2035  ;;  %1861 = vmatpush3.bf16.msra.mxu1 %v1858_v40  ;;  %v1930_v40 = vpack.c.bf16 %v884_v38, %v883_v37  ;;  %v1286_v37 = vld [vmem:[#allocation10 + $0x28] sm:$0xff] }
 0x362   :  { %v544_v55 = vmul.f32 %v2036_v54, %v2032_v35  ;;  %1863 = vmatprep.subr.bf16.mxu1 %v1862_v49  ;;  %v1926_v35 = vpack.c.bf16 %v882_v33, %v881_v32  ;;  %v894_v54 = vld [vmem:[#allocation8 + $0x78] sm:$0xff] }
 0x363   :  { %v1284_v32 = vld [vmem:[#allocation10 + $0x18] sm:$0xff] }
 0x364   :  { %1661 = vmatmul.mubr.msk.f32.vlgmr.msra.gmra.mrb[8].mxu0 %vm140_vm0, %v544_v55  ;;  %v1950_v55 = vpack.c.bf16 %v894_v54, %v893_v53  ;;  %v1381_v53 = vld [vmem:[#allocation11] sm:$0xff]  ;;  %v1382_v54 = vld [vmem:[#allocation11 + $0x8] sm:$0xff] }
 0x365   :  { %1893 = vmatpush3.bf16.msra.mxu0 %v1890_v42  ;;  %1865 = vmatpush3.bf16.msra.mxu1 %v1862_v49  ;;  %v886_v42 = vld [vmem:[#allocation8 + $0x38] sm:$0xff]  ;;  %v1942_v49 = vpack.c.bf16 %v890_v48, %v889_v47  ;;  %v1293_v47 = vld [vmem:[#allocation10 + $0x60] sm:$0xff]  ;;  %v1294_v48 = vld [vmem:[#allocation10 + $0x68] sm:$0xff] }
 0x366   :  { %1895 = vmatprep.subr.bf16.mxu0 %v1894_v56  ;;  %1867 = vmatprep.subr.bf16.mxu1 %v1866_v57  ;;  %v1934_v43 = vpack.c.bf16 %v886_v42, %v885_v41  ;;  %v1289_v42 = vld [vmem:[#allocation10 + $0x40] sm:$0xff] }
 0x369   :  { %1897 = vmatpush3.bf16.msra.mxu0 %v1894_v56  ;;  %1869 = vmatpush3.bf16.msra.mxu1 %v1866_v57  ;;  %v876_v56 = vld [vmem:[%s2501_s11] sm:$0xff] }
 0x36a   :  { %1899 = vmatprep.subr.bf16.mxu0 %v1898_v62  ;;  %1871 = vmatprep.subr.bf16.mxu1 %v1870_v63 }
 0x36d   :  { %1901 = vmatpush3.bf16.msra.mxu0 %v1898_v62  ;;  %1873 = vmatpush3.bf16.msra.mxu1 %v1870_v63 }
 0x36e   :  { %1903 = vmatprep.subr.bf16.mxu0 %v1902_v4  ;;  %1875 = vmatprep.subr.bf16.mxu1 %v1874_v6 }
 0x371   :  { %1905 = vmatpush3.bf16.msra.mxu0 %v1902_v4  ;;  %1877 = vmatpush3.bf16.msra.mxu1 %v1874_v6 }
 0x372   :  { %1907 = vmatprep.subr.bf16.mxu0 %v1906_v11  ;;  %1879 = vmatprep.subr.bf16.mxu1 %v1878_v12 }
 0x375   :  { %1909 = vmatpush3.bf16.msra.mxu0 %v1906_v11  ;;  %1881 = vmatpush3.bf16.msra.mxu1 %v1878_v12 }
 0x376   :  { %1911 = vmatprep.subr.bf16.mxu0 %v1910_v17  ;;  %1883 = vmatprep.subr.bf16.mxu1 %v1882_v18 }
 0x379   :  { %1913 = vmatpush3.bf16.msra.mxu0 %v1910_v17  ;;  %1885 = vmatpush3.bf16.msra.mxu1 %v1882_v18 }
 0x37a   :  { %1915 = vmatprep.subr.bf16.mxu0 %v1914_v21  ;;  %1887 = vmatprep.subr.bf16.mxu1 %v1886_v24 }
 0x37d   :  { %1917 = vmatpush3.bf16.msra.mxu0 %v1914_v21  ;;  %1889 = vmatpush3.bf16.msra.mxu1 %v1886_v24 }
 0x37e   :  { %1919 = vmatprep.subr.bf16.mxu0 %v1918_v27  ;;  %1923 = vmatprep.subr.bf16.mxu1 %v1922_v30 }
 0x381   :  { %1921 = vmatpush3.bf16.msra.mxu0 %v1918_v27  ;;  %v1282_v27 = vld [vmem:[#allocation10 + $0x8] sm:$0xff] }
 0x382   :  { %1768 = vmatprep.subr.mxu0 %v2217_v5 }
 0x433   :  { %v614_v31 = vpop.f32.mrb[2].mxu1 }
 0x434   :  { %v1657_v34 = vpop.f32.mrb[3].mxu1  ;;  %1695 = vmatprep.mubr.f32.mxu1 %v614_v31  ;;  %1730 = vmatprep.mubr.f32.mxu0 %v614_v31 }
 0x437   :  { %v687_v36 = vpop.f32.mrb[8].mxu0 }
 0x438   :  { %v1662_v39 = vpop.f32.mrb[9].mxu0  ;;  %1696 = vmatmul.mubr.f32.vlgmr.msra.gmra.mrb[4].mxu1 %v687_v36  ;;  %1731 = vmatmul.mubr.f32.vlgmr.msra.gmra.mrb[10].mxu0 %v687_v36 }
 0x439   :  { %1925 = vmatpush3.bf16.msra.mxu1 %v1922_v30  ;;  %1765 = vmatprep.mubr.f32.mxu1 %v614_v31  ;;  %v1954_v30 = vpack.c.bf16 %v1282_v27, %v1281_v26  ;;  %v1283_v31 = vld [vmem:[#allocation10 + $0x10] sm:$0xff] }
 0x43a   :  { %1927 = vmatprep.subr.bf16.mxu1 %v1926_v35  ;;  %1770 = vmatprep.mubr.msk.f32.mxu0 %vm2218_vm1, %v2217_v5  ;;  %v1287_v39 = vld [vmem:[#allocation10 + $0x30] sm:$0xff] }
 0x43d   :  { %1929 = vmatpush3.bf16.msra.mxu1 %v1926_v35  ;;  %v1958_v35 = vpack.c.bf16 %v1284_v32, %v1283_v31 }
 0x43e   :  { %1931 = vmatprep.subr.bf16.mxu1 %v1930_v40 }
 0x441   :  { %1933 = vmatpush3.bf16.msra.mxu1 %v1930_v40  ;;  %v1288_v40 = vld [vmem:[#allocation10 + $0x38] sm:$0xff] }
 0x442   :  { %1935 = vmatprep.subr.bf16.mxu1 %v1934_v43  ;;  %v1966_v41 = vpack.c.bf16 %v1288_v40, %v1287_v39 }
 0x445   :  { %1937 = vmatpush3.bf16.msra.mxu1 %v1934_v43  ;;  %v1290_v43 = vld [vmem:[#allocation10 + $0x48] sm:$0xff] }
 0x446   :  { %1939 = vmatprep.subr.bf16.mxu1 %v1938_v46 }
 0x449   :  { %1941 = vmatpush3.bf16.msra.mxu1 %v1938_v46  ;;  %v1974_v46 = vpack.c.bf16 %v1292_v45, %v1291_v44 }
 0x44a   :  { %1943 = vmatprep.subr.bf16.mxu1 %v1942_v49 }
 0x44d   :  { %1945 = vmatpush3.bf16.msra.mxu1 %v1942_v49  ;;  %v1978_v49 = vpack.c.bf16 %v1294_v48, %v1293_v47 }
 0x44e   :  { %1947 = vmatprep.subr.bf16.mxu1 %v1946_v52 }
 0x451   :  { %1949 = vmatpush3.bf16.msra.mxu1 %v1946_v52  ;;  %v1982_v52 = vpack.c.bf16 %v1296_v51, %v1295_v50 }
 0x452   :  { %1951 = vmatprep.subr.bf16.mxu1 %v1950_v55 }
 0x455   :  { %1953 = vmatpush3.bf16.msra.mxu1 %v1950_v55  ;;  %v1383_v55 = vld [vmem:[#allocation11 + $0x10] sm:$0xff] }
 0x458   :  { %1766 = vmatmul.mubr.f32.vlgmr.msra.gmra.mrb[6].mxu1 %v687_v36  ;;  %v1285_v36 = vld [vmem:[#allocation10 + $0x20] sm:$0xff] }
 0x459   :  { %v1962_v38 = vpack.c.bf16 %v1286_v37, %v1285_v36 }
 0x50b   :  { %v1697_v57 = vpop.f32.mrb[4].mxu1  ;;  %v1732_v58 = vpop.f32.mrb[10].mxu0 }
 0x50c   :  { %v773_v59 = vpop.f32.mrb[5].mxu1  ;;  %v867_v60 = vpop.f32.mrb[11].mxu0  ;;  %v878_v0 = vadd.f32 %v1732_v58, %v876_v56  ;;  %v784_v1 = vadd.f32 %v1697_v57, %v782_v61  ;;  %v1384_v57 = vld [vmem:[#allocation11 + $0x18] sm:$0xff] }
 0x50d   :  { %v877_v62 = vadd.f32 %v876_v56, %v867_v60  ;;  %v783_v63 = vadd.f32 %v782_v61, %v773_v59  ;;  %v1986_v56 = vpack.c.bf16 %v1382_v54, %v1381_v53  ;;  %v1990_v58 = vpack.c.bf16 %v1384_v57, %v1383_v55  ;;  %v1385_v59 = vld [vmem:[#allocation11 + $0x20] sm:$0xff]  ;;  %v1386_v60 = vld [vmem:[#allocation11 + $0x28] sm:$0xff] }
 0x50e   :  { %v1994_v61 = vpack.c.bf16 %v1386_v60, %v1385_v59 }
 0x50f   :  { %1769 = vmatpush3.xpose.msra.mxu0 %v877_v62  ;;  %1987 = vmatprep.subr.bf16.mxu1 %v1986_v56  ;;  %v1387_v62 = vld [vmem:[#allocation11 + $0x30] sm:$0xff] }
 0x510   :  { %1773 = vmatprep.subr.mxu0 %v2217_v5  ;;  %1989 = vmatpush3.bf16.msra.mxu1 %v1986_v56 }
 0x511   :  { %1991 = vmatprep.subr.bf16.mxu1 %v1990_v58 }
 0x512   :  { %1771 = vmatmul.mubr.f32.vlgmr.msra.gmra.mrb[12].mxu0 %v783_v63  ;;  %v1388_v63 = vld [vmem:[#allocation11 + $0x38] sm:$0xff] }
 0x513   :  { %1774 = vmatpush3.xpose.msra.mxu0 %v878_v0  ;;  %1775 = vmatprep.mubr.msk.f32.mxu0 %vm2218_vm1, %v2217_v5  ;;  %v1998_v0 = vpack.c.bf16 %v1388_v63, %v1387_v62 }
 0x514   :  { %1778 = vmatprep.subr.mxu0 %v2217_v5  ;;  %1993 = vmatpush3.bf16.msra.mxu1 %v1990_v58 }
 0x515   :  { %1995 = vmatprep.subr.bf16.mxu1 %v1994_v61 }
 0x516   :  { %1776 = vmatmul.mubr.f32.vlgmr.msra.gmra.mrb[14].mxu0 %v784_v1  ;;  %v1389_v1 = vld [vmem:[#allocation11 + $0x40] sm:$0xff] }
 0x517   :  { %1780 = vmatprep.mubr.msk.f32.mxu0 %vm2218_vm1, %v2217_v5 }
 0x518   :  { %1997 = vmatpush3.bf16.msra.mxu1 %v1994_v61 }
 0x519   :  { %1999 = vmatprep.subr.bf16.mxu1 %v1998_v0 }
 0x51c   :  { %2001 = vmatpush3.bf16.msra.mxu1 %v1998_v0 }
 0x52b   :  { %v1767_v3 = vpop.f32.mrb[6].mxu1 }
 0x52c   :  { %v972_v4 = vadd.f32 %v1767_v3, %v970_v2  ;;  %v961_v6 = vpop.f32.mrb[7].mxu1 }
 0x52d   :  { %v971_v7 = vadd.f32 %v970_v2, %v961_v6  ;;  %v1390_v2 = vld [vmem:[#allocation11 + $0x48] sm:$0xff]  ;;  %v1392_v6 = vld [vmem:[#allocation11 + $0x58] sm:$0xff] }
 0x52e   :  { %v2002_v3 = vpack.c.bf16 %v1390_v2, %v1389_v1 }
 0x52f   :  { %1779 = vmatpush3.msra.mxu0 %v971_v7 }
 0x530   :  { %1783 = vmatprep.subr.mxu0 %v2217_v5  ;;  %2003 = vmatprep.subr.bf16.mxu1 %v2002_v3 }
 0x531   :  { %2005 = vmatpush3.bf16.msra.mxu1 %v2002_v3 }
 0x5e5   :  { %v1039_v8 = vpop.f32.mrb[12].mxu0 }
 0x5e6   :  { %v1772_v9 = vpop.f32.mrb[13].mxu0  ;;  %v1113_v10 = vsel %vm140_vm0, %v1039_v8, -inf }
 0x5e7   :  { %1114 = vmax.xlane.f32.xlu0 %v1113_v10  ;;  %v1394_v9 = vld [vmem:[#allocation11 + $0x68] sm:$0xff] }
 0x5e9   :  { %v1109_v11 = vpop.f32.mrb[14].mxu0 }
 0x5ea   :  { %v1777_v12 = vpop.f32.mrb[15].mxu0  ;;  %v1116_v13 = vsel %vm140_vm0, %v1109_v11, -inf }
 0x5eb   :  { %1117 = vmax.xlane.f32.xlu1 %v1116_v13 }
 0x674   :  { %v1115_v14 = vpop.xlane.xlu0 %1114 }
 0x675   :  { %v1119_v15 = vsub.f32 %v1039_v8, %v1115_v14  ;;  %v1393_v8 = vld [vmem:[#allocation11 + $0x60] sm:$0xff] }
 0x676   :  { %v2010_v10 = vpack.c.bf16 %v1394_v9, %v1393_v8 }
 0x677   :  { %v1121_v16 = vmul.f32 1.442695, %v1119_v15  ;;  %v1395_v15 = vld [vmem:[#allocation11 + $0x70] sm:$0xff] }
 0x678   :  { %v1118_v17 = vpop.xlane.xlu1 %1117 }
 0x679   :  { %2037 = vpow2.f32 %v1121_v16  ;;  %v1120_v18 = vsub.f32 %v1109_v11, %v1118_v17  ;;  %v1396_v16 = vld [vmem:[#allocation11 + $0x78] sm:$0xff] }
 0x67a   :  { %v2014_v17 = vpack.c.bf16 %v1396_v16, %v1395_v15 }
 0x67b   :  { %v1123_v19 = vmul.f32 1.442695, %v1120_v18  ;;  %v1511_v18 = vld [vmem:[%s2504_s14] ss:$0 sm:$0xff]  ;;  %s2177_s14 = scalar_lea.vmem %s1487_s18, 256 }
 0x67c   :  { %p2178_p6 = scmp.ne.s32.totalorder %s1487_s18, %s2177_s14  ;;  %p2183_p8 = scmp.lt.s32.totalorder %s2177_s14, %s2177_s14 }
 0x67d   :  { %2039 = vpow2.f32 %v1123_v19 }
 0x67e   :  { %p2184_p9 = por %p2183_p8, %p2182_p7 }
 0x680   :  { %p2185_p10 = pnand %p2184_p9, %p2178_p6 }
 0x683   :  { %v2038_v20 = vpop.eup %2037 }
 0x684   :  { %v1125_v21 = vsel %vm140_vm0, %v2038_v20, 0.0 }
 0x685   :  { %1126 = vadd.xlane.f32.xlu0 %v1125_v21 }
 0x687   :  { %v2040_v22 = vpop.eup %2039 }
 0x688   :  { %v1128_v23 = vsel %vm140_vm0, %v2040_v22, 0.0 }
 0x689   :  { %1129 = vadd.xlane.f32.xlu1 %v1128_v23 }
 0x712   :  { %v1127_v24 = vpop.xlane.xlu0 %1126 }
 0x713   :  { %2041 = vrcp.f32 %v1127_v24 }
 0x716   :  { %v1130_v25 = vpop.xlane.xlu1 %1129 }
 0x717   :  { %2043 = vrcp.f32 %v1130_v25  ;;  %v1512_v25 = vld [vmem:[%s2506_s16] ss:$0 sm:$0xff] }
 0x71d   :  { %v2042_v28 = vpop.eup %2041 }
 0x71e   :  { %v1133_v29 = vmul.f32 %v2042_v28, %v2038_v20 }
 0x720   :  { %1781 = vmatmul.mubr.msk.f32.vlgmr.msra.gmra.mrb[16].mxu0 %vm140_vm0, %v1133_v29 }
 0x721   :  { %v2044_v33 = vpop.eup %2043  ;;  %1784 = vmatpush3.msra.mxu0 %v972_v4  ;;  %1785 = vmatprep.mubr.msk.f32.mxu0 %vm2218_vm1, %v2217_v5  ;;  %v1970_v5 = vpack.c.bf16 %v1290_v43, %v1289_v42  ;;  %v1391_v4 = vld [vmem:[#allocation11 + $0x50] sm:$0xff] }
 0x722   :  { %v1134_v34 = vmul.f32 %v2044_v33, %v2040_v22  ;;  %1955 = vmatprep.subr.bf16.mxu0 %v1954_v30  ;;  %v2006_v7 = vpack.c.bf16 %v1392_v6, %v1391_v4 }
 0x724   :  { %1786 = vmatmul.mubr.msk.f32.vlgmr.msra.gmra.mrb[18].mxu0 %vm140_vm0, %v1134_v34  ;;  %2007 = vmatprep.subr.bf16.mxu1 %v2006_v7 }
 0x725   :  { %1957 = vmatpush3.bf16.msra.mxu0 %v1954_v30  ;;  %2009 = vmatpush3.bf16.msra.mxu1 %v2006_v7 }
 0x726   :  { %1959 = vmatprep.subr.bf16.mxu0 %v1958_v35  ;;  %2011 = vmatprep.subr.bf16.mxu1 %v2010_v10 }
 0x729   :  { %1961 = vmatpush3.bf16.msra.mxu0 %v1958_v35  ;;  %2013 = vmatpush3.bf16.msra.mxu1 %v2010_v10 }
 0x72a   :  { %1963 = vmatprep.subr.bf16.mxu0 %v1962_v38  ;;  %2015 = vmatprep.subr.bf16.mxu1 %v2014_v17 }
 0x72d   :  { %1965 = vmatpush3.bf16.msra.mxu0 %v1962_v38  ;;  %2017 = vmatpush3.bf16.msra.mxu1 %v2014_v17 }
 0x72e   :  { %1967 = vmatprep.subr.bf16.mxu0 %v1966_v41 }
 0x731   :  { %1969 = vmatpush3.bf16.msra.mxu0 %v1966_v41 }
 0x732   :  { %1971 = vmatprep.subr.bf16.mxu0 %v1970_v5 }
 0x735   :  { %1973 = vmatpush3.bf16.msra.mxu0 %v1970_v5 }
 0x736   :  { %1975 = vmatprep.subr.bf16.mxu0 %v1974_v46 }
 0x739   :  { %1977 = vmatpush3.bf16.msra.mxu0 %v1974_v46 }
 0x73a   :  { %1979 = vmatprep.subr.bf16.mxu0 %v1978_v49 }
 0x73d   :  { %1981 = vmatpush3.bf16.msra.mxu0 %v1978_v49 }
 0x73e   :  { %1983 = vmatprep.subr.bf16.mxu0 %v1982_v52 }
 0x741   :  { %1985 = vmatpush3.bf16.msra.mxu0 %v1982_v52 }
 0x7f3   :  { %v1204_v11 = vpop.f32.mrb[16].mxu0 }
 0x7f4   :  { %v1782_v12 = vpop.f32.mrb[17].mxu0  ;;  %1820 = vmatprep.mubr.f32.mxu0 %v1204_v11 }
 0x7f7   :  { %v1277_v13 = vpop.f32.mrb[18].mxu0 }
 0x7f8   :  { %v1787_v14 = vpop.f32.mrb[19].mxu0  ;;  %1821 = vmatmul.mubr.f32.vlgmr.msra.gmra.mrb[20].mxu0 %v1277_v13 }
 0x8cb   :  { %v1822_v19 = vpop.f32.mrb[20].mxu0 }
 0x8cc   :  { %v1376_v20 = vadd.f32 %v1822_v19, %v1511_v18  ;;  %v1370_v21 = vpop.f32.mrb[21].mxu0 }
 0x8cd   :  { %v1371_v22 = vadd.f32 %v1511_v18, %v1370_v21 }
 0x8ce   :  { %v1380_v24 = vmax.f32 %v1376_v20, 0.0 }
 0x8cf   :  { %v1379_v23 = vmax.f32 %v1371_v22, 0.0 }
 0x8d1   :  { %1855 = vmatprep.mubr.f32.mxu1 %v1379_v23 }
 0x8d2   :  { %1856 = vmatmul.mubr.f32.vlgmr.msra.gmra.mrb[8].mxu1 %v1380_v24 }
 0x9a5   :  { %v1857_v26 = vpop.f32.mrb[8].mxu1 }
 0x9a6   :  { %v1476_v27 = vadd.f32 %v1857_v26, %v1512_v25  ;;  %v1470_v28 = vpop.f32.mrb[9].mxu1 }
 0x9a7   :  { %v1471_v29 = vadd.f32 %v1512_v25, %v1470_v28 }
 0x9a8   :  { %1480 = vst [vmem:[#allocation13 + $0x8] sm:$0xff] %v1476_v27 }
 0x9a9   :  { %1479 = vst [vmem:[#allocation13] sm:$0xff] %v1471_v29 }
 0x9aa   :  { %2188 = shalt.err (!%p2185_p10)
}
 0x9ab   :  { %s2515_s22 = sld [smem:[#allocation21_spill]] }
 0x9b1   :  { %s2189_s16 = scalar_lea.hbm %s2515_s22, 256 }
 0x9b2   :  { %p2190_p11 = scmp.ne.s32.totalorder %s2515_s22, %s2189_s16  ;;  %p2193_p12 = scmp.lt.u32.totalorder %s2189_s16, %s2515_s22 }
 0x9b4   :  { %p2195_p13 = pnand %p2193_p12, %p2190_p11 }
 0x9b6   :  { %2198 = shalt.err (!%p2195_p13)
}
 0x9b7   :  { %1492 = dma.vmem_to_hbm [thread:$0]  %s1487_s18, 256, %s2515_s22, [#allocation4], %s2210_s1, %s2210_s1, %s2211_s20  }
 0x9b8   :  { %2207 = dma.done.wait [#allocation4], 256  }
 0x9b9   :  { %2208 = vsyncadd [#allocation4], 4294967040 }
 0x9ba   :  { %1496 = vsyncpa [#allocation3], 1 }
 0x9bb   :  { %1497 = vsyncpa [#allocation6], 1 }
 0x9bc   :  { %1498 = vsyncpa [#allocation9], 1 }
 0x9bd   :  { %1499 = vsyncpa [#allocation12], 1 }
 0x9be   :  { %1500 = vsyncpa [#allocation4], 1 }

</bundles_post_ra>
